<compile_context>
chip_gen: v7x
topology: tpu7x:2x2x1
jax: 0.10.0
libtpu: 0.0.40
codegen_flags: <defaults>
</compile_context>

<pallas_src>
import jax
import jax.numpy as jnp
from jax.experimental import pallas as pl
from jax.experimental.pallas import tpu as pltpu


_LANES = 128  # lane-dense last dim: one full vreg width -> unmasked full vst


def _round_up(n, m):
    return ((n + m - 1) // m) * m


def _max_tile_rows(itemsize):
    """Tile rows so one (rows, 128) tile is ~2 MiB on v5e, ~4 MiB elsewhere.

    Resident VMEM = double-buffered (input + output) = 4 x tile bytes:
      v5e : 4 x 2 MiB =  8 MiB  (under its 16 MiB default scoped limit)
      v6e : 4 x 4 MiB = 16 MiB  (under 32 MiB default)
      v7x : 4 x 4 MiB = 16 MiB  (under 32 MiB default of its 64 MiB VMEM)
    """
    try:
        kind = jax.devices()[0].device_kind.lower()
    except Exception:  # pragma: no cover - defensive; fall back to safe size
        kind = ""
    tile_bytes = (2 << 20) if "v5" in kind else (4 << 20)
    return max(8, tile_bytes // (_LANES * itemsize))


def _adaptive_scale_kernel(alpha_ref, x_ref, y_ref):
    # alpha_ref: SMEM (1,) f32 scalar — sigmoid already applied in the wrapper.
    # x_ref, y_ref: VMEM (tile_rows, _LANES) tiles.
    y_ref[...] = x_ref[...] * alpha_ref[0].astype(x_ref.dtype)


@jax.jit
def adaptive_param_forward(raw_alpha, x):
    """raw_alpha: f32[1]; x: f32[...] (e.g. NCHW). Returns (alpha[1], alpha*x)."""
    # Scalar sigmoid once, outside the kernel (cheaper than per-grid-step EUP op).
    alpha = jax.nn.sigmoid(raw_alpha.astype(jnp.float32))

    total = x.size
    itemsize = x.dtype.itemsize
    x_flat = x.reshape(-1)

    # Main lane-dense slab: all full 128-wide rows, no padding.
    rows = total // _LANES
    main_total = rows * _LANES
    tail = total - main_total

    if rows > 0:
        x2d = x_flat[:main_total].reshape(rows, _LANES)
        tile_rows = min(_max_tile_rows(itemsize), _round_up(rows, 8))
        grid = (pl.cdiv(rows, tile_rows),)  # Pallas clips the last partial block.

        y2d = pl.pallas_call(
            _adaptive_scale_kernel,
            out_shape=jax.ShapeDtypeStruct((rows, _LANES), x.dtype),
            grid=grid,
            in_specs=[
                pl.BlockSpec(memory_space=pltpu.SMEM),                 # alpha scalar
                pl.BlockSpec((tile_rows, _LANES), lambda i: (i, 0)),   # x tile
            ],
            out_specs=pl.BlockSpec((tile_rows, _LANES), lambda i: (i, 0)),
            compiler_params=pltpu.CompilerParams(
                dimension_semantics=("parallel",),   # megacore split on v7x
            ),
            cost_estimate=pl.CostEstimate(
                flops=main_total,
                transcendentals=0,
                bytes_accessed=2 * main_total * itemsize,
            ),
        )(alpha, x2d)
        y_main = y2d.reshape(-1)
    else:
        y_main = jnp.zeros((0,), x.dtype)

    if tail > 0:
        # Ragged tail (<128 elems): tiny fused XLA multiply instead of padding
        # the whole tensor through the kernel.
        y_tail = x_flat[main_total:] * alpha[0].astype(x.dtype)
        y_flat = jnp.concatenate([y_main, y_tail])
    else:
        y_flat = y_main

    return alpha, y_flat.reshape(x.shape)


if __name__ == "__main__":
    # Deterministic parameter init matching nn.Parameter(torch.FloatTensor([1]))
    raw_alpha = jnp.array([1.0], dtype=jnp.float32)

    key = jax.random.PRNGKey(0)
    x = jax.random.normal(key, (2, 4, 16, 16), dtype=jnp.float32)  # NCHW

    alpha, y = adaptive_param_forward(raw_alpha, x)
    jax.block_until_ready((alpha, y))

    # Reference check in plain JAX
    alpha_ref = jax.nn.sigmoid(raw_alpha)
    y_ref = alpha_ref * x
    assert alpha.shape == (1,)
    assert y.shape == x.shape
    assert jnp.allclose(alpha, alpha_ref, atol=1e-6)
    assert jnp.allclose(y, y_ref, atol=1e-6)

    print("KERNEL_OK")
</pallas_src>

<mosaic_0001>
module attributes {stable_mosaic.version = 11 : i64} {
  func.func @_adaptive_scale_kernel(%arg0: i32, %arg1: memref<1xf32, #tpu.memory_space<smem>>, %arg2: memref<16x128xf32, #tpu.memory_space<vmem>>, %arg3: memref<16x128xf32, #tpu.memory_space<vmem>>) attributes {dimension_semantics = [#tpu.dimension_semantics<parallel>], iteration_bounds = array<i64: 1>, scalar_prefetch = 0 : i64, scratch_operands = 0 : i64, tpu.core_type = #tpu.core_type<tc>, window_params = [{transform_indices = @transform_0, window_bounds = array<i64: 1>}, {transform_indices = @transform_1, window_bounds = array<i64: 16, 128>}, {transform_indices = @transform_2, window_bounds = array<i64: 16, 128>}]} {
    %c0 = arith.constant 0 : index
    %c0_0 = arith.constant 0 : index
    %0 = vector.load %arg2[%c0, %c0_0] : memref<16x128xf32, #tpu.memory_space<vmem>>, vector<16x128xf32>
    %c0_1 = arith.constant 0 : index
    %1 = memref.load %arg1[%c0_1] : memref<1xf32, #tpu.memory_space<smem>>
    %2 = vector.broadcast %1 : f32 to vector<16x128xf32>
    %3 = arith.mulf %0, %2 : vector<16x128xf32>
    %c0_2 = arith.constant 0 : index
    %c0_3 = arith.constant 0 : index
    %4 = vector.load %arg3[%c0_2, %c0_3] : memref<16x128xf32, #tpu.memory_space<vmem>>, vector<16x128xf32>
    tpu.vector_store %arg3[%c0_2, %c0_3], %3 {strides = array<i32>} : memref<16x128xf32, #tpu.memory_space<vmem>>, vector<16x128xf32>,
    return
  }
  func.func @transform_0(%arg0: i32) -> i32 {
    %c0_i32 = arith.constant 0 : i32
    %c0_i32_0 = arith.constant 0 : i32
    return %c0_i32 : i32
  }
  func.func @transform_1(%arg0: i32) -> (i32, i32) {
    %c0_i32 = arith.constant 0 : i32
    %c0_i32_0 = arith.constant 0 : i32
    return %arg0, %c0_i32 : i32, i32
  }
  func.func @transform_2(%arg0: i32) -> (i32, i32) {
    %c0_i32 = arith.constant 0 : i32
    %c0_i32_0 = arith.constant 0 : i32
    return %arg0, %c0_i32 : i32, i32
  }
}

</mosaic_0001>

<bundles_post_ra>
// kernel: adaptive_param_forward.1
= control target key start
LH: loop header
LB: loop body
LE: loop exit
PB: predicated region body
PF: predicated region fallthrough
CT: control target
= control target key end

     0   :  { %s54_s0 = inlined_call_operand.<no memory space> [shape: f32[1], index: 0, kind: input, shape index: {}]   ;;  %s55_s1 = inlined_call_operand.vmem [shape: f32[16,128], index: 1, kind: input, shape index: {}]   ;;  %s56_s2 = inlined_call_operand.vmem [shape: f32[16,128], index: 2, kind: output, shape index: {}]  }
   0x1   :  { %v12_v0 = vld [vmem:[%s55_s1] sm:$0xff]  ;;  %v15_v1 = vstv %s54_s0  ;;  %v13_v2 = vld [vmem:[%s55_s1 + $0x8] sm:$0xff] }
   0x2   :  { %v16_v3 = vmul.f32 %v15_v1, %v12_v0  ;;  %v17_v4 = vmul.f32 %v15_v1, %v13_v2 }
   0x4   :  { %18 = vst [vmem:[%s56_s2] sm:$0xff] %v16_v3  ;;  %19 = vst [vmem:[%s56_s2 + $0x8] sm:$0xff] %v17_v4 }

</bundles_post_ra>
